<compile_context>
chip_gen: v6e
topology: v6e:2x2x1
jax: 0.10.0
libtpu: 0.0.40
codegen_flags: <defaults>
</compile_context>

<pallas_src>
import numpy as np
import jax
import jax.numpy as jnp
from jax.experimental import pallas as pl
from jax.experimental.pallas import tpu as pltpu

EMB_MIN_FREQ = 1.0
EMB_MAX_FREQ = 1000.0
EMBEDDING_DIMS = 32
LANE_WIDTH = 128              # TPU vreg lane count
DEFAULT_TILE_ROWS = 4096      # packed rows per grid step (2 MiB f32 output blocks)
SINGLE_BLOCK_MAX_ROWS = 1024  # <= this many packed rows -> single block (no grid split)
JNP_FALLBACK_ROWS = 512       # < this many packed rows -> plain jnp beats a pallas_call


def _round_up(a, m):
    return ((a + m - 1) // m) * m


def _make_angular_speeds(emb_min_freq=EMB_MIN_FREQ, emb_max_freq=EMB_MAX_FREQ,
                         embedding_dims=EMBEDDING_DIMS):
    """Same buffer as torch: 2*pi*exp(linspace(log(min_f), log(max_f), D//2))."""
    half = embedding_dims // 2
    freqs = np.exp(np.linspace(np.log(emb_min_freq), np.log(emb_max_freq), half))
    return jnp.asarray(2.0 * np.pi * freqs, dtype=jnp.float32)  # (half,)


def _sinusoidal_kernel(x_ref, wsel_ref, phase_ref, out_ref):
    # x_ref    : (tb, pack)    compact per-row scalars (pack batch elems per lane-row)
    # wsel_ref : (pack, lanes) Wsel[p, l] = w_full[l] if lane l belongs to slot p else 0
    # phase_ref: (1, lanes)    0 in sin lanes, +pi/2 in cos lanes  (cos(t) = sin(t+pi/2))
    # out_ref  : (tb, lanes)   lane-dense store, single transcendental, no concat/select
    pack = x_ref.shape[1]
    ang = x_ref[:, 0:1] * wsel_ref[0:1, :]                  # (tb,1)*(1,lanes) -> (tb,lanes)
    for p in range(1, pack):                                # unrolled; each lane receives
        ang = ang + x_ref[:, p:p + 1] * wsel_ref[p:p + 1, :]  # exactly one nonzero term
    out_ref[...] = jnp.sin(ang + phase_ref[...]).astype(out_ref.dtype)


def sinusoidal_embedding(x, angular_speeds=None, *, out_dtype=jnp.float32,
                         tile_rows=DEFAULT_TILE_ROWS,
                         single_block_max_rows=SINGLE_BLOCK_MAX_ROWS,
                         jnp_fallback_rows=JNP_FALLBACK_ROWS):
    """x: (B, 1) or (B,) float32 -> (B, embedding_dims) out_dtype."""
    if angular_speeds is None:
        angular_speeds = _make_angular_speeds()
    w = jnp.asarray(angular_speeds, jnp.float32).reshape(-1)          # (half,)
    half = w.shape[0]
    out_dim = 2 * half

    x_flat = jnp.asarray(x, jnp.float32).reshape(-1)                  # (B,)
    B = x_flat.shape[0]

    # Pack as many batch rows per 128-lane output row as fit (4 for out_dim=32).
    # pack == 1 (out_dim not dividing 128 / > 128) is correct but uses masked stores.
    pack = (LANE_WIDTH // out_dim
            if (0 < out_dim <= LANE_WIDTH and LANE_WIDTH % out_dim == 0) else 1)
    lanes = pack * out_dim
    rows = pl.cdiv(B, pack)

    if rows < jnp_fallback_rows:
        # Tiny batch: pallas_call launch overhead dominates; XLA's fused code wins.
        ang = x_flat[:, None] * w[None, :]
        return jnp.concatenate([jnp.sin(ang), jnp.cos(ang)], axis=-1).astype(out_dtype)

    # Tiling: big lane-dense blocks; for large B use >= 2 grid steps so v7x's two
    # TensorCores split the "parallel" batch axis.
    if rows <= single_block_max_rows:
        tb, grid_n = rows, 1          # block == full array -> no (8,128) constraint
    else:
        grid_n = max(pl.cdiv(rows, tile_rows), 2)
        tb = _round_up(pl.cdiv(rows, grid_n), 8)
    rows_pad = tb * grid_n
    b_pad = rows_pad * pack
    if b_pad != B:
        x_flat = jnp.pad(x_flat, (0, b_pad - B))
    x_packed = x_flat.reshape(rows_pad, pack)                         # contiguous reshape

    # Tiny constants: lane-tiled [w, w], pi/2 phase bias, per-slot zero-masked weights.
    w_full = jnp.concatenate([w, w])                                  # (out_dim,)
    w_lane = jnp.tile(w_full, pack)                                   # (lanes,)
    phase = jnp.tile(
        jnp.concatenate([jnp.zeros((half,), jnp.float32),
                         jnp.full((half,), np.pi / 2, jnp.float32)]),
        pack).reshape(1, lanes)                                       # (1, lanes)
    lane_slot = jnp.arange(lanes, dtype=jnp.int32) // out_dim
    wsel = jnp.where(lane_slot[None, :] == jnp.arange(pack, dtype=jnp.int32)[:, None],
                     w_lane[None, :], 0.0).astype(jnp.float32)        # (pack, lanes)

    out_packed = pl.pallas_call(
        _sinusoidal_kernel,
        out_shape=jax.ShapeDtypeStruct((rows_pad, lanes), out_dtype),
        grid=(grid_n,),
        in_specs=[
            pl.BlockSpec((tb, pack), lambda i: (i, 0)),
            pl.BlockSpec((pack, lanes), lambda i: (0, 0)),
            pl.BlockSpec((1, lanes), lambda i: (0, 0)),
        ],
        out_specs=pl.BlockSpec((tb, lanes), lambda i: (i, 0)),
        compiler_params=pltpu.CompilerParams(
            dimension_semantics=("parallel",)),   # v7x: 2 TCs split the batch axis
    )(x_packed, wsel, phase)

    out = out_packed.reshape(b_pad, out_dim)      # contiguous bitcast, not a copy
    if b_pad != B:
        out = out[:B]                             # only pays a copy when B % pack != 0
    return out


if __name__ == "__main__":
    key = jax.random.PRNGKey(0)
    angular_speeds = _make_angular_speeds()

    def reference(xv):
        ang = xv.reshape(-1, 1).astype(jnp.float32) * angular_speeds.reshape(1, -1)
        return jnp.concatenate([jnp.sin(ang), jnp.cos(ang)], axis=-1)

    # Small shape consistent with the module: per-sample scalar, (B, 1).
    # jnp_fallback_rows=0 forces the Pallas path even at tiny B.
    B = 8
    x = jax.random.uniform(key, (B, 1), dtype=jnp.float32)
    out = jax.block_until_ready(
        sinusoidal_embedding(x, angular_speeds, jnp_fallback_rows=0))
    assert out.shape == (B, EMBEDDING_DIMS) and out.dtype == jnp.float32
    np.testing.assert_allclose(np.asarray(out), np.asarray(reference(x)),
                               rtol=1e-4, atol=2e-3)

    # Ragged B (pad + tail slice) and the multi-step tiled "parallel" grid path.
    for B2 in (50, 8192):
        x2 = jax.random.uniform(jax.random.PRNGKey(1), (B2, 1), dtype=jnp.float32)
        out2 = jax.block_until_ready(
            sinusoidal_embedding(x2, angular_speeds, jnp_fallback_rows=0))
        assert out2.shape == (B2, EMBEDDING_DIMS)
        np.testing.assert_allclose(np.asarray(out2), np.asarray(reference(x2)),
                                   rtol=1e-4, atol=2e-3)

    # Default path at tiny B -> pure-jnp fallback (same math as the reference).
    out_fb = jax.block_until_ready(sinusoidal_embedding(x, angular_speeds))
    np.testing.assert_allclose(np.asarray(out_fb), np.asarray(reference(x)),
                               rtol=1e-6, atol=1e-6)

    # Optional bf16-output path (math in f32, cast only at the store).
    B3 = 64
    x3 = jax.random.uniform(jax.random.PRNGKey(2), (B3, 1), dtype=jnp.float32)
    out_bf16 = jax.block_until_ready(
        sinusoidal_embedding(x3, angular_speeds, out_dtype=jnp.bfloat16,
                             jnp_fallback_rows=0))
    assert out_bf16.shape == (B3, EMBEDDING_DIMS) and out_bf16.dtype == jnp.bfloat16
    np.testing.assert_allclose(np.asarray(out_bf16, dtype=np.float32),
                               np.asarray(reference(x3)), rtol=1e-2, atol=2.5e-2)

    print("KERNEL_OK")
</pallas_src>

<mosaic_0001>
module attributes {stable_mosaic.version = 11 : i64} {
  func.func @_sinusoidal_kernel(%arg0: i32, %arg1: memref<2x4xf32, #tpu.memory_space<vmem>>, %arg2: memref<4x128xf32, #tpu.memory_space<vmem>>, %arg3: memref<1x128xf32, #tpu.memory_space<vmem>>, %arg4: memref<2x128xf32, #tpu.memory_space<vmem>>) attributes {dimension_semantics = [#tpu.dimension_semantics<parallel>], iteration_bounds = array<i64: 1>, scalar_prefetch = 0 : i64, scratch_operands = 0 : i64, tpu.core_type = #tpu.core_type<tc>, window_params = [{transform_indices = @transform_0, window_bounds = array<i64: 2, 4>}, {pipeline_mode = #tpu.pipeline_mode<synchronous>, transform_indices = @transform_1, window_bounds = array<i64: 4, 128>}, {pipeline_mode = #tpu.pipeline_mode<synchronous>, transform_indices = @transform_2, window_bounds = array<i64: 1, 128>}, {transform_indices = @transform_3, window_bounds = array<i64: 2, 128>}]} {
    %c0 = arith.constant 0 : index
    %c0_0 = arith.constant 0 : index
    %0 = vector.load %arg1[%c0, %c0_0] : memref<2x4xf32, #tpu.memory_space<vmem>>, vector<2x1xf32>
    %c0_1 = arith.constant 0 : index
    %c0_2 = arith.constant 0 : index
    %1 = vector.load %arg2[%c0_1, %c0_2] : memref<4x128xf32, #tpu.memory_space<vmem>>, vector<1x128xf32>
    %2 = vector.broadcast %0 : vector<2x1xf32> to vector<2x128xf32>
    %3 = vector.broadcast %1 : vector<1x128xf32> to vector<2x128xf32>
    %4 = arith.mulf %2, %3 : vector<2x128xf32>
    %c0_3 = arith.constant 0 : index
    %c1 = arith.constant 1 : index
    %5 = vector.load %arg1[%c0_3, %c1] : memref<2x4xf32, #tpu.memory_space<vmem>>, vector<2x1xf32>
    %c1_4 = arith.constant 1 : index
    %c0_5 = arith.constant 0 : index
    %6 = vector.load %arg2[%c1_4, %c0_5] : memref<4x128xf32, #tpu.memory_space<vmem>>, vector<1x128xf32>
    %7 = vector.broadcast %5 : vector<2x1xf32> to vector<2x128xf32>
    %8 = vector.broadcast %6 : vector<1x128xf32> to vector<2x128xf32>
    %9 = arith.mulf %7, %8 : vector<2x128xf32>
    %10 = arith.addf %4, %9 : vector<2x128xf32>
    %c0_6 = arith.constant 0 : index
    %c2 = arith.constant 2 : index
    %11 = vector.load %arg1[%c0_6, %c2] : memref<2x4xf32, #tpu.memory_space<vmem>>, vector<2x1xf32>
    %c2_7 = arith.constant 2 : index
    %c0_8 = arith.constant 0 : index
    %12 = vector.load %arg2[%c2_7, %c0_8] : memref<4x128xf32, #tpu.memory_space<vmem>>, vector<1x128xf32>
    %13 = vector.broadcast %11 : vector<2x1xf32> to vector<2x128xf32>
    %14 = vector.broadcast %12 : vector<1x128xf32> to vector<2x128xf32>
    %15 = arith.mulf %13, %14 : vector<2x128xf32>
    %16 = arith.addf %10, %15 : vector<2x128xf32>
    %c0_9 = arith.constant 0 : index
    %c3 = arith.constant 3 : index
    %17 = vector.load %arg1[%c0_9, %c3] : memref<2x4xf32, #tpu.memory_space<vmem>>, vector<2x1xf32>
    %c3_10 = arith.constant 3 : index
    %c0_11 = arith.constant 0 : index
    %18 = vector.load %arg2[%c3_10, %c0_11] : memref<4x128xf32, #tpu.memory_space<vmem>>, vector<1x128xf32>
    %19 = vector.broadcast %17 : vector<2x1xf32> to vector<2x128xf32>
    %20 = vector.broadcast %18 : vector<1x128xf32> to vector<2x128xf32>
    %21 = arith.mulf %19, %20 : vector<2x128xf32>
    %22 = arith.addf %16, %21 : vector<2x128xf32>
    %c0_12 = arith.constant 0 : index
    %c0_13 = arith.constant 0 : index
    %23 = vector.load %arg3[%c0_12, %c0_13] : memref<1x128xf32, #tpu.memory_space<vmem>>, vector<1x128xf32>
    %24 = vector.broadcast %23 : vector<1x128xf32> to vector<2x128xf32>
    %25 = arith.addf %22, %24 : vector<2x128xf32>
    %26 = math.sin %25 : vector<2x128xf32>
    %c0_14 = arith.constant 0 : index
    %c0_15 = arith.constant 0 : index
    %27 = vector.load %arg4[%c0_14, %c0_15] : memref<2x128xf32, #tpu.memory_space<vmem>>, vector<2x128xf32>
    tpu.vector_store %arg4[%c0_14, %c0_15], %26 {strides = array<i32>} : memref<2x128xf32, #tpu.memory_space<vmem>>, vector<2x128xf32>,
    return
  }
  func.func @transform_0(%arg0: i32) -> (i32, i32) {
    %c0_i32 = arith.constant 0 : i32
    %c0_i32_0 = arith.constant 0 : i32
    return %arg0, %c0_i32 : i32, i32
  }
  func.func @transform_1(%arg0: i32) -> (i32, i32) {
    %c0_i32 = arith.constant 0 : i32
    %c0_i32_0 = arith.constant 0 : i32
    %c0_i32_1 = arith.constant 0 : i32
    return %c0_i32, %c0_i32_0 : i32, i32
  }
  func.func @transform_2(%arg0: i32) -> (i32, i32) {
    %c0_i32 = arith.constant 0 : i32
    %c0_i32_0 = arith.constant 0 : i32
    %c0_i32_1 = arith.constant 0 : i32
    return %c0_i32, %c0_i32_0 : i32, i32
  }
  func.func @transform_3(%arg0: i32) -> (i32, i32) {
    %c0_i32 = arith.constant 0 : i32
    %c0_i32_0 = arith.constant 0 : i32
    return %arg0, %c0_i32 : i32, i32
  }
}

</mosaic_0001>

<bundles_post_ra>
// kernel: tpu_custom_call.1
= control target key start
LH: loop header
LB: loop body
LE: loop exit
PB: predicated region body
PF: predicated region fallthrough
CT: control target
= control target key end

     0   :  { %8 = vsyncpa [#allocation3], 0  ;;  %s380_s0 = inlined_call_operand.hbm [shape: f32[2,4], index: 0, kind: input, shape index: {}]   ;;  %s381_s1 = inlined_call_operand.hbm [shape: f32[4,128], index: 1, kind: input, shape index: {}]   ;;  %s382_s2 = inlined_call_operand.vmem [shape: f32[1,128], index: 2, kind: input, shape index: {}]   ;;  %s383_s3 = inlined_call_operand.hbm [shape: f32[2,128], index: 3, kind: output, shape index: {}]  }
   0x1   :  { %9 = vsyncpa [#allocation6], 0 }
   0x2   :  { %10 = vsyncpa [#allocation4], 0  ;;  %s314_s12 = smov [#allocation2]   ;;  %s315_s14 = smov [#allocation5]  }
   0x3   :  { %s17_s13 = sshll.u32 %s314_s12, 4  ;;  %s27_s15 = sshll.u32 %s315_s14, 4  ;;  %s18_s13 = int_to_ptr.vmem [resolvable:$true] %s17_s13  ;;  %s28_s15 = int_to_ptr.vmem [resolvable:$true] %s27_s15 }
   0x4   :  { %s256_s16 = scalar_lea.vmem %s18_s13, 32  ;;  %p261_p1 = scmp.lt.s32.totalorder %s18_s13, %s18_s13 }
   0x5   :  { %p257_p0 = scmp.ne.s32.totalorder %s18_s13, %s256_s16  ;;  %p262_p2 = scmp.lt.s32.totalorder %s256_s16, %s256_s16 }
   0x7   :  { %p263_p3 = por %p262_p2, %p261_p1 }
   0x9   :  { %p264_p4 = pnand %p263_p3, %p257_p0 }
   0xb   :  { %267 = shalt.err (!%p264_p4)
}
   0xc   :  { %20 = dma.hbm_to_vmem [thread:$0]  %s380_s0, 32, %s18_s13, [#allocation3]  }
   0xd   :  { %s276_s19 = scalar_lea.vmem %s28_s15, 64  ;;  %p281_p6 = scmp.lt.s32.totalorder %s28_s15, %s28_s15 }
   0xe   :  { %p277_p5 = scmp.ne.s32.totalorder %s28_s15, %s276_s19  ;;  %p282_p7 = scmp.lt.s32.totalorder %s276_s19, %s276_s19 }
  0x10   :  { %p283_p8 = por %p282_p7, %p281_p6 }
  0x12   :  { %p284_p9 = pnand %p283_p8, %p277_p5 }
  0x14   :  { %287 = shalt.err (!%p284_p9)
}
  0x15   :  { %30 = dma.hbm_to_vmem [thread:$0]  %s381_s1, 64, %s28_s15, [#allocation6]  }
  0x16   :  { %308 = dma.done.wait [#allocation3], 32  }
  0x17   :  { %309 = vsyncadd [#allocation3], 4294967264 }
  0x18   :  { %310 = dma.done.wait [#allocation6], 64  }
  0x19   :  { %311 = vsyncadd [#allocation6], 4294967232  ;;  %v316_v0 = vmov 0   ;;  %v317_v1 = vmov 2   ;;  %v39_v2 = vld [vmem:[#allocation2] sm:$0x3] }
  0x1a   :  { %239 = vset.pattern.permute.xlu0 %v316_v0  ;;  %241 = vset.pattern.permute.xlu1 %v317_v1  ;;  %v318_v3 = vmov 1   ;;  %v319_v4 = vmov 3   ;;  %v213_v7 = vld [vmem:[#allocation5] ss:$0 sm:$0xff]  ;;  %v214_v8 = vld [vmem:[#allocation5 + $0x1] ss:$0 sm:$0xff] }
  0x1b   :  { %43 = vperm.xlu0 %239, %v39_v2   ;;  %64 = vperm.xlu1 %241, %v39_v2   ;;  %v215_v9 = vld [vmem:[#allocation5 + $0x2] ss:$0 sm:$0xff]  ;;  %v216_v11 = vld [vmem:[#allocation5 + $0x3] ss:$0 sm:$0xff]  ;;  %v217_v19 = vld [vmem:[%s382_s2] ss:$0 sm:$0xff] }
  0x1c   :  { %v320_v32 = vmov 683565275   ;;  %v321_v34 = vmov 2475754826   ;;  %v322_v37 = vmov 2131351028  }
  0x1d   :  { %v323_v40 = vmov 2102212464   ;;  %v324_v43 = vmov 920167782   ;;  %v325_v46 = vmov 1326507024  }
  0x1e   :  { %s326_s2 = smov [#allocation7]  }
  0x1f   :  { %240 = vset.pattern.permute.xlu0 %v318_v3  ;;  %242 = vset.pattern.permute.xlu1 %v319_v4  ;;  %s203_s22 = sshll.u32 %s326_s2, 4  ;;  %s204_s22 = int_to_ptr.vmem [resolvable:$true] %s203_s22 }
  0x20   :  { %53 = vperm.xlu0 %240, %v39_v2   ;;  %75 = vperm.xlu1 %242, %v39_v2   ;;  %s288_s23 = scalar_lea.vmem %s204_s22, 32  ;;  %p293_p11 = scmp.lt.s32.totalorder %s204_s22, %s204_s22 }
  0x21   :  { %p289_p10 = scmp.ne.s32.totalorder %s204_s22, %s288_s23  ;;  %p294_p12 = scmp.lt.s32.totalorder %s288_s23, %s288_s23 }
  0x23   :  { %p295_p13 = por %p294_p12, %p293_p11 }
  0x24   :  { %243 = vset.pattern.permute.xlu0 %v319_v4 }
  0x25   :  { %p296_p0 = pnand %p295_p13, %p289_p10 }
  0x96   :  { %v44_v5 = vpop.permute.xlu0 %43  ;;  %v65_v6 = vpop.permute.xlu1 %64 }
  0x97   :  { %v50_v13 = vmul.f32 %v213_v7, %v44_v5  ;;  %v71_v15 = vmul.f32 %v215_v9, %v65_v6 }
  0x9b   :  { %v54_v10 = vpop.permute.xlu0 %53  ;;  %v76_v12 = vpop.permute.xlu1 %75 }
  0x9c   :  { %v60_v14 = vmul.f32 %v214_v8, %v54_v10  ;;  %v82_v17 = vmul.f32 %v216_v11, %v76_v12 }
  0x9e   :  { %v61_v16 = vadd.f32 %v60_v14, %v50_v13 }
  0xa0   :  { %v72_v18 = vadd.f32 %v71_v15, %v61_v16 }
  0xa2   :  { %v83_v20 = vadd.f32 %v82_v17, %v72_v18 }
  0xa4   :  { %v356_v21 = vadd.f32 %v217_v19, %v83_v20 }
  0xa6   :  { %v95_v22 = vand.u32 2139095040, %v356_v21  ;;  %v92_v26 = vand.u32 2147483647, %v356_v21  ;;  %vm94_vm7 = vcmp.lt.s32.totalorder %v356_v21, 0  ;;  %vm184_vm12 = vweird.f32 %v356_v21 }
  0xa8   :  { %v96_v23 = vshrl.u32 %v95_v22, 23  ;;  %v99_v30 = vand.u32 8388607, %v92_v26  ;;  %vm93_vm8 = vcmp.le.f32.partialorder %v92_v26, 0.7853982 }
  0xaa   :  { %v218_v24 = vadd.s32 4294967169, %v96_v23  ;;  %v100_v48 = vor.u32 8388608, %v99_v30 }
  0xac   :  { %v102_v25 = vadd.s32 1, %v218_v24  ;;  %v140_v62 = vshll.u32 %v100_v48, 8 }
  0xae   :  { %vm103_vm0 = vcmp.gt.s32.totalorder %v102_v25, 0 }
  0xaf   :  { %v104_v27 = vsel %vm103_vm0, %v102_v25, 0 }
  0xb0   :  { %v106_v28 = vand.u32 31, %v104_v27  ;;  %v105_v31 = vshrl.u32 %v104_v27, 5 }
  0xb2   :  { %v107_v29 = vsub.s32 32, %v106_v28  ;;  %v109_v33 = vshll.u32 %v320_v32, %v106_v28  ;;  %v112_v35 = vshll.u32 %v321_v34, %v106_v28  ;;  %v115_v39 = vshll.u32 %v322_v37, %v106_v28 }
  0xb3   :  { %v118_v42 = vshll.u32 %v323_v40, %v106_v28  ;;  %v121_v45 = vshll.u32 %v324_v43, %v106_v28  ;;  %vm124_vm1 = vcmp.lt.s32.totalorder %v105_v31, 1  ;;  %vm127_vm2 = vcmp.lt.s32.totalorder %v105_v31, 4 }
  0xb4   :  { %v110_v36 = vshrl.u32 %v321_v34, %v107_v29  ;;  %v113_v38 = vshrl.u32 %v322_v37, %v107_v29  ;;  %v116_v41 = vshrl.u32 %v323_v40, %v107_v29  ;;  %v119_v44 = vshrl.u32 %v324_v43, %v107_v29 }
  0xb5   :  { %v122_v47 = vshrl.u32 %v325_v46, %v107_v29  ;;  %v108_v57 = vshrl.u32 %v320_v32, %v107_v29  ;;  %vm126_vm3 = vcmp.lt.s32.totalorder %v105_v31, 3  ;;  %vm125_vm4 = vcmp.lt.s32.totalorder %v105_v31, 2 }
  0xb6   :  { %v111_v49 = vor.u32 %v110_v36, %v109_v33  ;;  %v114_v50 = vor.u32 %v113_v38, %v112_v35  ;;  %v117_v51 = vor.u32 %v116_v41, %v115_v39  ;;  %v120_v52 = vor.u32 %v119_v44, %v118_v42 }
  0xb7   :  { %v123_v53 = vor.u32 %v122_v47, %v121_v45 }
  0xb8   :  { %v129_v54 = vsel %vm127_vm2, %v117_v51, 2102212464  ;;  %v132_v55 = vsel %vm124_vm1, %v111_v49, %v114_v50  ;;  %v136_v56 = vsel %vm124_vm1, %v114_v50, %v117_v51  ;;  %v133_v58 = vsel %vm127_vm2, %v120_v52, 920167782 }
  0xb9   :  { %v137_v59 = vsel %vm127_vm2, %v123_v53, 1326507024  ;;  %v134_v60 = vsel %vm126_vm3, %v117_v51, %v133_v58  ;;  %v128_v63 = vsel %vm124_vm1, %v108_v57, %v111_v49  ;;  %v130_v0 = vsel %vm126_vm3, %v114_v50, %v129_v54 }
  0xba   :  { %v138_v61 = vsel %vm126_vm3, %v120_v52, %v137_v59  ;;  %v135_v1 = vsel %vm125_vm4, %v132_v55, %v134_v60  ;;  %v131_v7 = vsel %vm125_vm4, %v128_v63, %v130_v0 }
  0xbb   :  { %v139_v2 = vsel %vm125_vm4, %v136_v56, %v138_v61  ;;  %v365_v5 = vmul.u32.u64.low %v140_v62, %v135_v1  ;;  %v366_v6 = vmul.u32.u64.high %v140_v62, %v135_v1, %v365_v5  ;;  %v147_v9 = vmul.u32 %v140_v62, %v131_v7 }
  0xbc   :  { %v362_v3 = vmul.u32.u64.low %v140_v62, %v139_v2  ;;  %v363_v4 = vmul.u32.u64.high %v140_v62, %v139_v2, %v362_v3 }
  0xbd   :  { %v150_v8 = vadd.s32 1, %v366_v6 }
  0xbe   :  { %vm149_vm5 = vc.u32 %v363_v4, %v365_v5  ;;  %v148_v22 = vadd.s32 %v365_v5, %v363_v4 }
  0xbf   :  { %v151_v10 = vsel %vm149_vm5, %v150_v8, %v366_v6 }
  0xc0   :  { %v152_v11 = vadd.s32 %v151_v10, %v147_v9 }
  0xc2   :  { %v153_v12 = vadd.s32 536870912, %v152_v11 }
  0xc4   :  { %v154_v13 = vshrl.u32 %v153_v12, 30 }
  0xc6   :  { %v155_v14 = vshll.u32 %v154_v13, 30  ;;  %v178_v36 = vsub.s32 4, %v154_v13 }
  0xc8   :  { %v156_v15 = vsub.s32 %v152_v11, %v155_v14  ;;  %v179_v39 = vsel %vm94_vm7, %v178_v36, %v154_v13 }
  0xc9   :  { %v181_v40 = vsel %vm93_vm8, 0, %v179_v39 }
  0xca   :  { %v158_v16 = vsub.s32 0, %v156_v15  ;;  %v185_v41 = vadd.s32 3, %v181_v40 }
  0xcc   :  { %v219_v17 = vmin.u32 %v158_v16, %v156_v15  ;;  %v186_v42 = vand.u32 3, %v185_v41 }
  0xce   :  { %v160_v18 = vclz %v219_v17  ;;  %vm191_vm9 = vcmp.eq.s32.totalorder %v186_v42, 2  ;;  %vm188_vm10 = vcmp.eq.s32.totalorder %v186_v42, 0  ;;  %vm187_vm11 = vcmp.lt.s32.totalorder %v186_v42, 2 }
  0xd0   :  { %v220_v19 = vadd.s32 4294967294, %v160_v18 }
  0xd2   :  { %vm221_vm6 = vcmp.lt.s32.totalorder %v220_v19, 0 }
  0xd3   :  { %v163_v20 = vsel %vm221_vm6, 0, %v220_v19 }
  0xd4   :  { %v164_v23 = vsub.s32 32, %v163_v20  ;;  %v168_v24 = vsub.s32 4294967266, %v163_v20  ;;  %v165_v25 = vshll.u32 %v156_v15, %v163_v20 }
  0xd6   :  { %v166_v27 = vshrl.u32 %v148_v22, %v164_v23  ;;  %v169_v28 = vadd.s32 127, %v168_v24 }
  0xd8   :  { %v167_v29 = vor.u32 %v166_v27, %v165_v25  ;;  %v170_v30 = vshll.u32 %v169_v28, 23 }
  0xda   :  { %v171_v31 = vor.u32 4788187, %v170_v30  ;;  %v174_v33 = vcvt.s32.f32 %v167_v29 }
  0xdc   :  { %v172_v32 = vand.u32 2147483647, %v171_v31 }
  0xde   :  { %v175_v34 = vmul.f32 %v174_v33, %v172_v32 }
  0xe0   :  { %v176_v35 = vxor.u32 2147483648, %v175_v34 }
  0xe2   :  { %v177_v37 = vsel %vm94_vm7, %v176_v35, %v175_v34 }
  0xe3   :  { %v180_v38 = vsel %vm93_vm8, %v356_v21, %v177_v37 }
  0xe4   :  { %244 = vcosq.f32 %v180_v38 }
  0xe5   :  { %246 = vsinq.f32 %v180_v38 }
  0xf1   :  { %v245_v43 = vpop.eup %244 }
  0xf2   :  { %v247_v44 = vpop.eup %246  ;;  %v192_v45 = vxor.u32 2147483648, %v245_v43 }
  0xf3   :  { %v189_v46 = vxor.u32 2147483648, %v247_v44 }
  0xf4   :  { %v193_v47 = vsel %vm191_vm9, %v192_v45, %v247_v44 }
  0xf5   :  { %v190_v26 = vsel %vm188_vm10, %v245_v43, %v189_v46 }
  0xf6   :  { %v194_v48 = vsel %vm187_vm11, %v190_v26, %v193_v47 }
  0xf7   :  { %v195_v49 = vsel %vm184_vm12, nan, %v194_v48 }
  0xf8   :  { %196 = vst [vmem:[#allocation7] sm:$0x3] %v195_v49 }
  0xf9   :  { %299 = shalt.err (!%p296_p0)
}
  0xfa   :  { %206 = dma.vmem_to_hbm [thread:$0]  %s204_s22, 32, %s383_s3, [#allocation4]  }
  0xfb   :  { %312 = dma.done.wait [#allocation4], 32  }
  0xfc   :  { %313 = vsyncadd [#allocation4], 4294967264 }
  0xfd   :  { %210 = vsyncpa [#allocation3], 1 }
  0xfe   :  { %211 = vsyncpa [#allocation6], 1 }
  0xff   :  { %212 = vsyncpa [#allocation4], 1 }

</bundles_post_ra>
